<compile_context>
chip_gen: v7x
topology: tpu7x:2x2x1
jax: 0.10.0
libtpu: 0.0.40
codegen_flags: <defaults>
</compile_context>

<pallas_src>
import math
import functools

import jax
import jax.numpy as jnp
from jax.experimental import pallas as pl
from jax.experimental.pallas import tpu as pltpu


COMPUTE_DTYPE = jnp.bfloat16            # MXU-native matmul dtype (fp32 accumulation)
VMEM_LIMIT_BYTES = 48 * 1024 * 1024     # stay well under v7x's 64 MiB physical VMEM
TILE_VMEM_BUDGET = 18 * 1024 * 1024     # rough per-grid-step working-set target
DEFAULT_MAX_TILE_ROWS = 4096            # cap on TH*W rows per tile (amortizes per-step cost)


# ----------------------------------------------------------------------------
# Tile-size heuristic: largest row-tile TH dividing H that fits the VMEM budget
# ----------------------------------------------------------------------------
def _choose_tile_rows(H, W, Cin, Cout, K, max_rows):
    pad = K // 2
    act = jnp.dtype(COMPUTE_DTYPE).itemsize
    for th in range(H, 0, -1):
        if H % th:
            continue
        rows = th * W
        est = (2 * (th + 2 * pad) * (W + 2 * pad) * Cin * act   # double-buffered input tile
               + rows * K * K * Cin * act                       # im2col patches (bf16)
               + rows * Cout * 4                                # fp32 accumulator / epilogue
               + 2 * rows * Cout * act                          # double-buffered output tile
               + K * K * Cin * Cout * act)                      # weights
        if rows <= max_rows and est <= TILE_VMEM_BUDGET:
            return th
    return 1


# ----------------------------------------------------------------------------
# Pallas kernel: fused (PReLU -> KxK conv (im2col matmul) -> bias/scale/residuals)
# ----------------------------------------------------------------------------
def _conv_im2col_kernel(*refs, TH, W, K, Cin, Cout, has_act, n_res, out_scale, res_scales):
    it = iter(refs)
    x_ref = next(it)                       # (1, TH+K-1, W+K-1, Cin)  halo'd, zero-padded, bf16
    w_ref = next(it)                       # (K*K*Cin, Cout)          bf16
    b_ref = next(it)                       # (1, Cout)                fp32 (already *out_scale)
    a_ref = next(it) if has_act else None  # (1, Cin)                 fp32 PReLU slopes
    res_refs = [next(it) for _ in range(n_res)]   # each (1, TH, W, Cout)
    o_ref = next(it)                       # (1, TH, W, Cout)

    xv = x_ref[0]                          # (THp, Wp, Cin)
    if has_act:
        a = a_ref[...].astype(xv.dtype)    # broadcasts over the channel (lane) dim
        xv = jnp.where(xv > 0, xv, xv * a)  # PReLU; PReLU(0)=0 so the zero halo stays zero

    rows = TH * W
    # Build the im2col operand: K*K shifted windows concatenated along channels.
    pieces = []
    for kh in range(K):
        for kw in range(K):
            pieces.append(xv[kh:kh + TH, kw:kw + W, :].reshape(rows, Cin))
    patches = jnp.concatenate(pieces, axis=-1)            # (rows, K*K*Cin)  bf16

    # One MXU matmul with contraction depth K*K*Cin, fp32 accumulation.
    acc = jnp.dot(patches, w_ref[...], preferred_element_type=jnp.float32)

    out = acc if out_scale == 1.0 else acc * out_scale
    out = out + b_ref[...]                                # bias was pre-scaled by out_scale
    for r_ref, s in zip(res_refs, res_scales):            # fused residual adds (epilogue)
        r = r_ref[0].reshape(rows, Cout).astype(jnp.float32)
        out = out + (r if s == 1.0 else r * s)
    o_ref[0] = out.reshape(TH, W, Cout).astype(o_ref.dtype)


def conv2d_fused(x, w, b, alpha=None, residuals=(), out_scale=1.0,
                 out_dtype=None, max_tile_rows=DEFAULT_MAX_TILE_ROWS):
    """Fused (optional PReLU) -> same-padded KxK conv -> bias/scale/residual epilogue.

    x:         (N, H, W, Cin)
    w:         (K, K, Cin, Cout)
    b:         (Cout,)
    alpha:     optional (Cin,) PReLU slopes applied to x before the conv
    residuals: sequence of (scale, tensor(N, H, W, Cout)) added in the epilogue
    out_scale: scalar multiplied onto (conv + bias) before the residual adds
    returns:   (N, H, W, Cout) in out_dtype (default bf16)
    """
    N, H, W, Cin = x.shape
    K, Cout = int(w.shape[0]), int(w.shape[3])
    pad = K // 2
    out_dtype = out_dtype or COMPUTE_DTYPE
    out_scale = float(out_scale)
    residuals = tuple(residuals)

    TH = _choose_tile_rows(H, W, Cin, Cout, K, max_tile_rows)
    nt = H // TH
    THp, Wp = TH + 2 * pad, W + 2 * pad

    # Single staging copy per conv: zero-pad + halo-expand row tiles (also casts to bf16
    # so every HBM round trip is half width).
    xp = jnp.pad(x.astype(COMPUTE_DTYPE), ((0, 0), (pad, pad), (pad, pad), (0, 0)))
    xt = jnp.stack([xp[:, t * TH:t * TH + THp] for t in range(nt)], axis=1)
    xt = xt.reshape(N * nt, THp, Wp, Cin)

    w2 = w.reshape(K * K * Cin, Cout).astype(COMPUTE_DTYPE)
    b2 = (b.astype(jnp.float32) * out_scale).reshape(1, Cout)

    in_specs = [
        pl.BlockSpec((1, THp, Wp, Cin), lambda n, t: (n * nt + t, 0, 0, 0)),
        pl.BlockSpec((K * K * Cin, Cout), lambda n, t: (0, 0)),
        pl.BlockSpec((1, Cout), lambda n, t: (0, 0)),
    ]
    args = [xt, w2, b2]
    if alpha is not None:
        in_specs.append(pl.BlockSpec((1, Cin), lambda n, t: (0, 0)))
        args.append(alpha.astype(jnp.float32).reshape(1, Cin))
    for s, r in residuals:
        assert r.shape == (N, H, W, Cout), (r.shape, (N, H, W, Cout))
        in_specs.append(pl.BlockSpec((1, TH, W, Cout), lambda n, t: (n, t, 0, 0)))
        args.append(r)

    bytes_accessed = (xt.size * xt.dtype.itemsize
                      + w2.size * w2.dtype.itemsize + b2.size * 4
                      + N * H * W * Cout * jnp.dtype(out_dtype).itemsize
                      + sum(r.size * r.dtype.itemsize for _, r in residuals))
    cost = pl.CostEstimate(flops=2 * N * H * W * K * K * Cin * Cout,
                           transcendentals=0,
                           bytes_accessed=int(bytes_accessed))

    kernel = functools.partial(
        _conv_im2col_kernel, TH=TH, W=W, K=K, Cin=Cin, Cout=Cout,
        has_act=alpha is not None, n_res=len(residuals),
        out_scale=out_scale, res_scales=tuple(float(s) for s, _ in residuals))

    return pl.pallas_call(
        kernel,
        out_shape=jax.ShapeDtypeStruct((N, H, W, Cout), out_dtype),
        grid=(N, nt),
        in_specs=in_specs,
        out_specs=pl.BlockSpec((1, TH, W, Cout), lambda n, t: (n, t, 0, 0)),
        compiler_params=pltpu.CompilerParams(
            dimension_semantics=("parallel", "parallel"),
            vmem_limit_bytes=VMEM_LIMIT_BYTES),
        cost_estimate=cost,
    )(*args)


# ----------------------------------------------------------------------------
# Pure-JAX reference conv with the identical bf16 storage / fp32 accumulation policy
# ----------------------------------------------------------------------------
def conv2d_reference(x, w, b, alpha=None, residuals=(), out_scale=1.0,
                     out_dtype=None, max_tile_rows=None):
    del max_tile_rows
    out_dtype = out_dtype or COMPUTE_DTYPE
    xv = x.astype(COMPUTE_DTYPE)
    if alpha is not None:
        a = alpha.astype(xv.dtype).reshape(1, 1, 1, -1)
        xv = jnp.where(xv > 0, xv, xv * a)
    acc = jax.lax.conv_general_dilated(
        xv, w.astype(COMPUTE_DTYPE), window_strides=(1, 1), padding="SAME",
        dimension_numbers=("NHWC", "HWIO", "NHWC"),
        preferred_element_type=jnp.float32)
    out = acc * out_scale + b.astype(jnp.float32) * out_scale
    for s, r in residuals:
        out = out + s * r.astype(jnp.float32)
    return out.astype(out_dtype)


# ----------------------------------------------------------------------------
# Plain-JAX glue (cheap relative to the convs)
# ----------------------------------------------------------------------------
def pixel_shuffle_nhwc(x, r):
    # Matches torch.nn.PixelShuffle: out[n, h*r+dh, w*r+dw, c] = x[n, h, w, c*r*r + dh*r + dw]
    N, H, W, C = x.shape
    c = C // (r * r)
    x = x.reshape(N, H, W, c, r, r)
    x = x.transpose(0, 1, 4, 2, 5, 3)
    return x.reshape(N, H * r, W * r, c)


def resblock_forward(x, p, conv_fn, max_tile_rows):
    # yn = x ; G_yn = conv3(relu3(conv1(relu1(x))))
    G = conv_fn(x, p["w1"], p["b1"], alpha=p["a1"], max_tile_rows=max_tile_rows)
    G = conv_fn(G, p["w3"], p["b3"], alpha=p["a3"], max_tile_rows=max_tile_rows)
    y1 = G + x                                                 # yn_1 = G_yn + yn
    z = conv_fn(y1, p["w2"], p["b2"], alpha=p["a2"], max_tile_rows=max_tile_rows)
    s = float(p["scale1"])                                     # 0.5
    # out = scale1*(conv4(relu4(z)) + G_yn) + yn, all fused into conv4's epilogue
    return conv_fn(z, p["w4"], p["b4"], alpha=p["a4"],
                   residuals=((s, G), (1.0, x)), out_scale=s,
                   max_tile_rows=max_tile_rows)


def oisr_forward(x_nchw, params, conv_fn=None, max_tile_rows=DEFAULT_MAX_TILE_ROWS):
    conv_fn = conv_fn or conv2d_fused
    x = jnp.transpose(x_nchw, (0, 2, 3, 1)).astype(jnp.float32)   # NCHW -> NHWC

    # sub_mean: MeanShift weight is eye(3)/std (diagonal 1x1 conv) => exact per-channel affine.
    x = x * params["sub_scale"] + params["sub_bias"]

    # head conv
    x = conv_fn(x, params["head_w"], params["head_b"], max_tile_rows=max_tile_rows)

    # body (long skip fused into the body-tail conv's epilogue)
    res = x
    for blk in params["body_blocks"]:
        res = resblock_forward(res, blk, conv_fn, max_tile_rows)
    res = conv_fn(res, params["body_tail_w"], params["body_tail_b"],
                  residuals=((1.0, x),), max_tile_rows=max_tile_rows)

    # tail: Upsampler (conv -> PixelShuffle) x steps, then final conv
    t = res
    for (w, b, r) in params["upsampler"]:
        t = conv_fn(t, w, b, max_tile_rows=max_tile_rows)
        # TODO(synk): fuse the PixelShuffle permutation into the conv's output store
        # (out_spec index_map) to avoid one full-resolution HBM round trip.
        t = pixel_shuffle_nhwc(t, r)
    t = conv_fn(t, params["tail_w"], params["tail_b"],
                out_dtype=jnp.float32, max_tile_rows=max_tile_rows)

    # add_mean: diagonal 1x1 conv => per-channel affine (exact).
    t = t * params["add_scale"] + params["add_bias"]

    return jnp.transpose(t, (0, 3, 1, 2))                        # back to NCHW


# ----------------------------------------------------------------------------
# Deterministic parameter initialization (shapes per OISR.__init__)
# ----------------------------------------------------------------------------
def init_params(key, scale, n_resblocks, n_feats, n_colors, rgb_range):
    keys = iter(jax.random.split(key, 1024))

    def conv_init(cin, cout, k):
        fan = cin * k * k
        w = jax.random.normal(next(keys), (k, k, cin, cout), jnp.float32) / math.sqrt(fan)
        b = jax.random.normal(next(keys), (cout,), jnp.float32) * 0.01
        return w, b

    rgb_mean = jnp.array([0.4488, 0.4371, 0.404], jnp.float32)
    rgb_std = jnp.array([1.0, 1.0, 1.0], jnp.float32)

    params = {}
    params["sub_scale"] = 1.0 / rgb_std
    params["sub_bias"] = -1.0 * rgb_range * rgb_mean / rgb_std
    params["add_scale"] = 1.0 / rgb_std
    params["add_bias"] = +1.0 * rgb_range * rgb_mean / rgb_std

    params["head_w"], params["head_b"] = conv_init(n_colors, n_feats, 3)

    blocks = []
    for _ in range(n_resblocks):
        p = {}
        for i in (1, 2, 3, 4):
            p[f"w{i}"], p[f"b{i}"] = conv_init(n_feats, n_feats, 3)
            p[f"a{i}"] = jnp.full((n_feats,), 0.25, jnp.float32)   # nn.PReLU(n_feats, 0.25)
        p["scale1"] = 0.5                                          # nn.Parameter([0.5])
        blocks.append(p)
    params["body_blocks"] = blocks

    params["body_tail_w"], params["body_tail_b"] = conv_init(n_feats, n_feats, 3)

    ups = []
    if (scale & (scale - 1)) == 0:
        for _ in range(int(math.log2(scale))):
            w, b = conv_init(n_feats, 4 * n_feats, 3)
            ups.append((w, b, 2))
    elif scale == 3:
        w, b = conv_init(n_feats, 9 * n_feats, 3)
        ups.append((w, b, 3))
    else:
        raise NotImplementedError
    params["upsampler"] = ups

    params["tail_w"], params["tail_b"] = conv_init(n_feats, n_colors, 3)
    return params


# ----------------------------------------------------------------------------
if __name__ == "__main__":
    # Small, OISR-consistent shapes: batch=2, 3 colors, 16x16 spatial, n_feats=32,
    # n_resblocks=2, scale=2.
    N, C, H, W = 2, 3, 16, 16
    scale = 2
    n_feats = 32
    n_resblocks = 2
    rgb_range = 1.0

    x = jax.random.normal(jax.random.PRNGKey(0), (N, C, H, W), jnp.float32)
    params = init_params(jax.random.PRNGKey(1), scale, n_resblocks, n_feats, C, rgb_range)

    # Small max_tile_rows so the demo exercises the multi-row-tile (N x tiles) grid path;
    # real SR inputs use the larger DEFAULT_MAX_TILE_ROWS.
    y = oisr_forward(x, params, conv_fn=conv2d_fused, max_tile_rows=128)
    y = jax.block_until_ready(y)

    assert y.shape == (N, C, H * scale, W * scale), y.shape
    assert bool(jnp.all(jnp.isfinite(y)))

    # Validate against a pure-JAX reference that uses the same bf16 storage policy.
    y_ref = jax.block_until_ready(oisr_forward(x, params, conv_fn=conv2d_reference))
    err = float(jnp.max(jnp.abs(y - y_ref)) / (jnp.max(jnp.abs(y_ref)) + 1e-6))
    assert err < 2e-2, f"mismatch vs lax.conv reference: rel-max err {err}"

    print("KERNEL_OK")
</pallas_src>

<mosaic_0001>
module attributes {stable_mosaic.version = 11 : i64} {
  func.func @_conv_im2col_kernel(%arg0: i32, %arg1: i32, %arg2: memref<1x10x18x3xbf16, #tpu.memory_space<vmem>>, %arg3: memref<27x32xbf16, #tpu.memory_space<vmem>>, %arg4: memref<1x32xf32, #tpu.memory_space<vmem>>, %arg5: memref<1x8x16x32xbf16, #tpu.memory_space<vmem>>) attributes {dimension_semantics = [#tpu.dimension_semantics<parallel>, #tpu.dimension_semantics<parallel>], iteration_bounds = array<i64: 2, 2>, scalar_prefetch = 0 : i64, scratch_operands = 0 : i64, tpu.core_type = #tpu.core_type<tc>, window_params = [{transform_indices = @transform_0, window_bounds = array<i64: 1, 10, 18, 3>}, {pipeline_mode = #tpu.pipeline_mode<synchronous>, transform_indices = @transform_1, window_bounds = array<i64: 27, 32>}, {pipeline_mode = #tpu.pipeline_mode<synchronous>, transform_indices = @transform_2, window_bounds = array<i64: 1, 32>}, {transform_indices = @transform_3, window_bounds = array<i64: 1, 8, 16, 32>}]} {
    %c0 = arith.constant 0 : index
    %c0_0 = arith.constant 0 : index
    %c0_1 = arith.constant 0 : index
    %c0_2 = arith.constant 0 : index
    %0 = vector.load %arg2[%c0, %c0_0, %c0_1, %c0_2] : memref<1x10x18x3xbf16, #tpu.memory_space<vmem>>, vector<1x10x18x3xbf16>
    %1 = vector.shape_cast %0 : vector<1x10x18x3xbf16> to vector<10x18x3xbf16>
    %2 = vector.extract_strided_slice %1 {offsets = [0, 0, 0], sizes = [8, 16, 3], strides = [1, 1, 1]} : vector<10x18x3xbf16> to vector<8x16x3xbf16>
    %3 = vector.shape_cast %2 : vector<8x16x3xbf16> to vector<128x3xbf16>
    %4 = vector.extract_strided_slice %1 {offsets = [0, 1, 0], sizes = [8, 16, 3], strides = [1, 1, 1]} : vector<10x18x3xbf16> to vector<8x16x3xbf16>
    %5 = vector.shape_cast %4 : vector<8x16x3xbf16> to vector<128x3xbf16>
    %6 = vector.extract_strided_slice %1 {offsets = [0, 2, 0], sizes = [8, 16, 3], strides = [1, 1, 1]} : vector<10x18x3xbf16> to vector<8x16x3xbf16>
    %7 = vector.shape_cast %6 : vector<8x16x3xbf16> to vector<128x3xbf16>
    %8 = vector.extract_strided_slice %1 {offsets = [1, 0, 0], sizes = [8, 16, 3], strides = [1, 1, 1]} : vector<10x18x3xbf16> to vector<8x16x3xbf16>
    %9 = vector.shape_cast %8 : vector<8x16x3xbf16> to vector<128x3xbf16>
    %10 = vector.extract_strided_slice %1 {offsets = [1, 1, 0], sizes = [8, 16, 3], strides = [1, 1, 1]} : vector<10x18x3xbf16> to vector<8x16x3xbf16>
    %11 = vector.shape_cast %10 : vector<8x16x3xbf16> to vector<128x3xbf16>
    %12 = vector.extract_strided_slice %1 {offsets = [1, 2, 0], sizes = [8, 16, 3], strides = [1, 1, 1]} : vector<10x18x3xbf16> to vector<8x16x3xbf16>
    %13 = vector.shape_cast %12 : vector<8x16x3xbf16> to vector<128x3xbf16>
    %14 = vector.extract_strided_slice %1 {offsets = [2, 0, 0], sizes = [8, 16, 3], strides = [1, 1, 1]} : vector<10x18x3xbf16> to vector<8x16x3xbf16>
    %15 = vector.shape_cast %14 : vector<8x16x3xbf16> to vector<128x3xbf16>
    %16 = vector.extract_strided_slice %1 {offsets = [2, 1, 0], sizes = [8, 16, 3], strides = [1, 1, 1]} : vector<10x18x3xbf16> to vector<8x16x3xbf16>
    %17 = vector.shape_cast %16 : vector<8x16x3xbf16> to vector<128x3xbf16>
    %18 = vector.extract_strided_slice %1 {offsets = [2, 2, 0], sizes = [8, 16, 3], strides = [1, 1, 1]} : vector<10x18x3xbf16> to vector<8x16x3xbf16>
    %19 = vector.shape_cast %18 : vector<8x16x3xbf16> to vector<128x3xbf16>
    %20 = tpu.concatenate %3, %5, %7, %9, %11, %13, %15, %17, %19 in 1 : vector<128x3xbf16>, vector<128x3xbf16>, vector<128x3xbf16>, vector<128x3xbf16>, vector<128x3xbf16>, vector<128x3xbf16>, vector<128x3xbf16>, vector<128x3xbf16>, vector<128x3xbf16> -> vector<128x27xbf16>
    %c0_3 = arith.constant 0 : index
    %c0_4 = arith.constant 0 : index
    %21 = vector.load %arg3[%c0_3, %c0_4] : memref<27x32xbf16, #tpu.memory_space<vmem>>, vector<27x32xbf16>
    %cst = arith.constant dense<0.000000e+00> : vector<128x32xf32>
    %22 = tpu.matmul %20, %21, %cst {dimension_numbers = #tpu.dot_dimension_numbers<[1], [0], [0], [1], [0, 0, 1, 1], [], []>} : vector<128x27xbf16>, vector<27x32xbf16>, vector<128x32xf32> -> vector<128x32xf32>
    %c0_5 = arith.constant 0 : index
    %c0_6 = arith.constant 0 : index
    %23 = vector.load %arg4[%c0_5, %c0_6] : memref<1x32xf32, #tpu.memory_space<vmem>>, vector<1x32xf32>
    %24 = vector.broadcast %23 : vector<1x32xf32> to vector<128x32xf32>
    %25 = arith.addf %22, %24 : vector<128x32xf32>
    %26 = vector.shape_cast %25 : vector<128x32xf32> to vector<8x16x32xf32>
    %27 = arith.truncf %26 : vector<8x16x32xf32> to vector<8x16x32xbf16>
    %c0_7 = arith.constant 0 : index
    %c0_8 = arith.constant 0 : index
    %c0_9 = arith.constant 0 : index
    %c0_10 = arith.constant 0 : index
    %28 = vector.load %arg5[%c0_7, %c0_8, %c0_9, %c0_10] : memref<1x8x16x32xbf16, #tpu.memory_space<vmem>>, vector<1x8x16x32xbf16>
    %29 = vector.shape_cast %28 : vector<1x8x16x32xbf16> to vector<8x16x32xbf16>
    %30 = vector.shape_cast %27 : vector<8x16x32xbf16> to vector<1x8x16x32xbf16>
    tpu.vector_store %arg5[%c0_7, %c0_8, %c0_9, %c0_10], %30 {strides = array<i32>} : memref<1x8x16x32xbf16, #tpu.memory_space<vmem>>, vector<1x8x16x32xbf16>,
    return
  }
  func.func @transform_0(%arg0: i32, %arg1: i32) -> (i32, i32, i32, i32) {
    %c2_i32 = arith.constant 2 : i32
    %0 = arith.muli %arg0, %c2_i32 : i32
    %1 = arith.addi %0, %arg1 : i32
    %c0_i32 = arith.constant 0 : i32
    %c0_i32_0 = arith.constant 0 : i32
    %c0_i32_1 = arith.constant 0 : i32
    %c0_i32_2 = arith.constant 0 : i32
    return %1, %c0_i32, %c0_i32_0, %c0_i32_1 : i32, i32, i32, i32
  }
  func.func @transform_1(%arg0: i32, %arg1: i32) -> (i32, i32) {
    %c0_i32 = arith.constant 0 : i32
    %c0_i32_0 = arith.constant 0 : i32
    %c0_i32_1 = arith.constant 0 : i32
    return %c0_i32, %c0_i32_0 : i32, i32
  }
  func.func @transform_2(%arg0: i32, %arg1: i32) -> (i32, i32) {
    %c0_i32 = arith.constant 0 : i32
    %c0_i32_0 = arith.constant 0 : i32
    %c0_i32_1 = arith.constant 0 : i32
    return %c0_i32, %c0_i32_0 : i32, i32
  }
  func.func @transform_3(%arg0: i32, %arg1: i32) -> (i32, i32, i32, i32) {
    %c0_i32 = arith.constant 0 : i32
    %c0_i32_0 = arith.constant 0 : i32
    %c0_i32_1 = arith.constant 0 : i32
    return %arg0, %arg1, %c0_i32, %c0_i32_0 : i32, i32, i32, i32
  }
}

</mosaic_0001>

<bundles_post_ra>
// kernel: tpu_custom_call.1
= control target key start
LH: loop header
LB: loop body
LE: loop exit
PB: predicated region body
PF: predicated region fallthrough
CT: control target
= control target key end

     0   :  { %8 = vsyncpa [#allocation3], 0  ;;  %s2367_s0 = inlined_call_operand.vmem [shape: bf16[4,10,18,3], index: 0, kind: input, shape index: {}]   ;;  %s2368_s1 = inlined_call_operand.vmem [shape: bf16[27,32], index: 1, kind: input, shape index: {}]   ;;  %s2369_s2 = inlined_call_operand.vmem [shape: f32[1,32], index: 2, kind: input, shape index: {}]   ;;  %s2370_s3 = inlined_call_operand.hbm [shape: bf16[2,16,16,32], index: 3, kind: output, shape index: {}]  }
   0x1   :  { %10 = vsyncpa [#allocation3 + $0x1], 0  ;;  %s1612_s12 = smov 0   ;;  %s1614_s13 = smov 0  }
   0x2   :  { %s1616_s14 = smov 0   ;;  %s1618_s15 = smov 0  }
   0x3   :  { %s1620_s16 = smov 0   ;;  %s1622_s17 = smov 0  }
   0x4   :  { %s1624_s18 = smov 0   ;;  %s1626_s19 = smov 0  }
   0x5 LB: > { %s1254_s20 = sadd.s32 4294967295, %s1578_s19   ;;  %s1255_s21 = sadd.s32 4294967294, %s1578_s19   ;;  %s1578_s19 = sphi %s1626_s19, %s16_s19   ;;  %s1574_s18 = sphi %s1624_s18, %s2383_s18   ;;  %s1570_s17 = sphi %s1622_s17, %s2382_s17   ;;  %s1566_s16 = sphi %s1620_s16, %s2381_s16   ;;  %s1562_s15 = sphi %s1618_s15, %s2380_s15   ;;  %s1558_s14 = sphi %s1616_s14, %s2379_s14   ;;  %s1554_s13 = sphi %s1614_s13, %s2378_s13   ;;  %s1550_s12 = sphi %s1612_s12, %s2377_s12  }
   0x6   : > { %s25_s22 = sadd.s32 1, %s1570_s17  ;;  %s28_s23 = sadd.s32 1, %s1574_s18 }
   0x7   : > { %p26_p0 = scmp.ge.s32.totalorder %s25_s22, 2  ;;  %p119_p1 = scmp.ne.s32.totalorder %s1558_s14, %s1554_s13 }
   0x8   : > { %p120_p2 = scmp.eq.s32.totalorder %s1254_s20, 3  ;;  %p125_p5 = scmp.ne.s32.totalorder %s1554_s13, %s1550_s12 }
   0x9   : > { %s2385_s22 = smov (%p26_p0, %s25_s22), 0  ;;  %s2387_s23 = smov (!%p26_p0, %s28_s23), %s1574_s18 }
   0xa   : > { %s105_s24 = ssub.s32 %s1570_s17, %s2385_s22  ;;  %p1663_p3 = por %p120_p2, %p119_p1 }
   0xb   : > { %p30_p4 = scmp.ge.s32.totalorder %s2387_s23, 2  ;;  %p126_p6 = scmp.eq.s32.totalorder %s1255_s21, 3 }
   0xc   : > { %p1260_p7 = scmp.ge.s32.totalorder %s1578_s19, 1  ;;  %p162_p9 = scmp.lt.s32.totalorder %s1578_s19, 5 }
   0xd   : > { %s2389_s23 = smov (%p30_p4, %s2387_s23), 0  ;;  %p1672_p8 = por %p126_p6, %p125_p5 }
   0xe   : > { %s104_s27 = ssub.s32 %s1574_s18, %s2389_s23  ;;  %s109_s28 = sadd.s32 1, %s1558_s14 }
   0xf   : > { %s106_s29 = sor.u32 %s105_s24, %s104_s27  ;;  %p163_p10 = pnand %p1260_p7, %p162_p9 }
  0x10   : > { %p107_p11 = scmp.eq.s32.totalorder %s106_s29, 0  ;;  %s1262_s4 = sshll.u32 (!%p163_p10), %s1566_s16, 1  ;;  %vm448_vm0 = vcmask (!%p163_p10), 1042432   ;;  %vm449_vm1 = vcmask (!%p163_p10), 1046532   ;;  %vm229_vm2 = vsmask.f32 (!%p163_p10), 3328 }
  0x11   : > { %166 = sbr.rel (%p163_p10) target bundleno = 517 (0x205), region = 32  ;;  %s189_s5 = sadd.s32 (!%p163_p10), %s1562_s15, %s1262_s4  ;;  %vm230_vm3 = vsmask.f32 (!%p163_p10), 7440  ;;  %vm1759_vm4 = vmor (!%p163_p10), %vm448_vm0, %vm449_vm1  ;;  %vm976_vm6 = vcmask (!%p163_p10), 1044480   ;;  %vm977_vm7 = vcmask (!%p163_p10), 1045504   ;;  %vm793_vm8 = vcmask (!%p163_p10), 23552  }
  0x12   : > { %s1681_s30 = scalar_select %p107_p11, %s1558_s14, %s109_s28  }
  0x13   : > { %p190_p12 = scmp.lt.s32.totalorder (!%p163_p10), %s189_s5, 3  ;;  %s1580_s10 = smov (!%p163_p10), 9   ;;  %vm1809_vm5 = vmor (!%p163_p10), %vm229_vm2, %vm230_vm3  ;;  %vm818_vm9 = vcmask (!%p163_p10), 48128   ;;  %vm835_vm10 = vcmask (!%p163_p10), 72704   ;;  %vm852_vm11 = vcmask (!%p163_p10), 97280   ;;  %vm869_vm12 = vcmask (!%p163_p10), 121856  }
  0x14   : > { %s1581_s11 = smov (!%p163_p10), 6   ;;  %s1582_s20 = smov (!%p163_p10), 3   ;;  %vm886_vm13 = vcmask (!%p163_p10), 146432   ;;  %vm903_vm14 = vcmask (!%p163_p10), 171008   ;;  %vm920_vm15 = vcmask (!%p163_p10), 195584   ;;  %vm959_vm0 = vcmask (!%p163_p10), 220160  }
  0x15   : > { %s1583_s21 = smov (!%p163_p10), 12   ;;  %s1584_s24 = smov (!%p163_p10), 15   ;;  %vm1144_vm1 = vcmask (!%p163_p10), 257024  }
  0x16   : > { %s1585_s27 = smov (!%p163_p10), 18   ;;  %s1586_s28 = smov (!%p163_p10), 21  }
  0x17   : > { %s185_s8 = sand.u32 (!%p163_p10), 1, %s1554_s13   ;;  %s1589_s7 = smov (!%p163_p10), [#allocation2]  }
  0x18   : > { %s2391_s5 = smov (!%p190_p12, %s189_s5), 3 }
  0x19   : > { %s1389_s6 = smul.u32 120, %s2391_s5  ;;  %s1587_s5 = smov 24  }
  0x1b   : > { %s1688_s9 = scalar_lea.vmem %s2367_s0, %s1389_s6 }
  0x1c   : > { %v1691_v0 = vld [vmem:[%s1688_s9 + $0x3c] sm:$0xf]  ;;  %v1694_v1 = vld [vmem:[%s1688_s9 + $0x40] sm:$0xf]  ;;  %v1697_v2 = vld [vmem:[%s1688_s9 + $0xc] sm:$0xf] }
  0x1d   : > { %v366_v3 = vshrl.u32 %v1694_v1, 16  ;;  %v1702_v4 = vcombine.low %v1691_v0, %v1694_v1  ;;  %v353_v5 = vshrl.u32 %v1691_v0, 16  ;;  %v356_v6 = vshll.u32 %v1691_v0, 16  ;;  %v1707_v7 = vld [vmem:[%s1688_s9 + $0x10] sm:$0xf] }
  0x1e   : > { %v266_v8 = vshll.u32 %v1707_v7, 16  ;;  %v270_v9 = vshrl.u32 %v1707_v7, 16  ;;  %v1713_v10 = vcombine.low %v1697_v2, %v1707_v7  ;;  %v257_v11 = vshrl.u32 %v1697_v2, 16  ;;  %v1717_v12 = vld [vmem:[%s1688_s9 + $0x48] sm:$0xf] }
  0x1f   : > { %690 = vrot.lane.b32.xlu1 %v1702_v4, %s1580_s10  ;;  %v260_v13 = vshll.u32 %v1697_v2, 16  ;;  %v1723_v14 = vld [vmem:[%s1688_s9 + $0x4c] sm:$0xf]  ;;  %v377_v15 = vshrl.u32 %v1717_v12, 16  ;;  %v380_v16 = vshll.u32 %v1717_v12, 16  ;;  %v1269_v17 = vrot.slane %v1691_v0, 9 }
  0x20   : > { %v1728_v18 = vrot.slane %v270_v9, 4  ;;  %682 = vrot.lane.b32.xlu0 %v1713_v10, %s1580_s10  ;;  %v259_v19 = vrot.slane %v257_v11, 4  ;;  %v390_v20 = vshrl.u32 %v1723_v14, 16  ;;  %v1735_v21 = vcombine.low %v1717_v12, %v1723_v14  ;;  %v1738_v22 = vld [vmem:[%s1688_s9 + $0x18] sm:$0xf] }
  0x21   : > { %v262_v23 = vrot.slane %v260_v13, 5  ;;  %v1741_v24 = vld [vmem:[%s1688_s9 + $0x1c] sm:$0xf]  ;;  %v281_v25 = vshrl.u32 %v1738_v22, 16  ;;  %v284_v26 = vshll.u32 %v1738_v22, 16  ;;  %v488_v27 = vrot.slane %v1694_v1, 5 }
  0x22   : > { %v294_v28 = vshrl.u32 %v1741_v24, 16  ;;  %v1749_v29 = vcombine.low %v1738_v22, %v1741_v24  ;;  %v1752_v30 = vld [vmem:[%s1688_s9 + $0x30] sm:$0xf]  ;;  %v1755_v31 = vld [vmem:[%s1688_s9 + $0x34] sm:$0xf]  ;;  %v1265_v33 = vrot.slane %v1697_v2, 9 }
  0x23   : > { %692 = vrot.lane.b32.xlu1 %v1735_v21, %s1580_s10  ;;  %v1767_v34 = vld [vmem:[%s1688_s9 + $0x38] sm:$0x1]  ;;  %v1268_v35 = vrot.slane %v1752_v30, 9  ;;  %v481_v36 = vrot.slane %v1755_v31, 5  ;;  %v1772_v37 = vld [vmem:[%s1688_s9] sm:$0xf]  ;;  %v263_v38 = vor.u32 %v262_v23, %v259_v19  ;;  %v489_v43 = vsel %vm1759_vm4, %v1269_v17, %v488_v27 }
  0x24   : > { %684 = vrot.lane.b32.xlu0 %v1749_v29, %s1580_s10  ;;  %v484_v39 = vrot.slane %v1767_v34, 5  ;;  %v1778_v40 = vld [vmem:[%s1688_s9 + $0x4] sm:$0xf]  ;;  %v201_v41 = vld [vmem:[%s1688_s9 + $0x8] sm:$0x1]  ;;  %v1264_v42 = vrot.slane %v1772_v37, 9  ;;  %v1786_v44 = vcombine.low %v1752_v30, %v1755_v31 }
  0x25   : > { %v482_v45 = vsel %vm1759_vm4, %v1268_v35, %v481_v36  ;;  %v483_v46 = vrot.slane %v481_v36, 4  ;;  %v453_v47 = vrot.slane %v1778_v40, 5  ;;  %v456_v48 = vrot.slane %v201_v41, 5  ;;  %v1792_v49 = vld [vmem:[%s1688_s9 + $0x44] sm:$0x1] }
  0x26   : > { %v490_v50 = vrot.slane %v488_v27, 4  ;;  %v491_v51 = vrot.slane %v1792_v49, 5  ;;  %v204_v52 = vld [vmem:[%s1688_s9 + $0x14] sm:$0x1]  ;;  %v460_v53 = vrot.slane %v1707_v7, 5  ;;  %v264_v54 = vrot.slane %v263_v38, 4 }
  0x27   : > { %v485_v55 = vsel %vm1759_vm4, %v483_v46, %v484_v39  ;;  %v454_v56 = vsel %vm1759_vm4, %v1264_v42, %v453_v47  ;;  %v455_v57 = vrot.slane %v453_v47, 4  ;;  %v463_v58 = vrot.slane %v204_v52, 5 }
  0x28   : > { %v1801_v59 = vcombine.low %v482_v45, %v485_v55  ;;  %v492_v60 = vsel %vm1759_vm4, %v490_v50, %v491_v51  ;;  %v461_v61 = vsel %vm1759_vm4, %v1265_v33, %v460_v53  ;;  %v462_v62 = vrot.slane %v460_v53, 4 }
  0x29   : > { %v457_v2 = vsel %vm1759_vm4, %v455_v57, %v456_v48  ;;  %v1815_v9 = vcombine.low %v489_v43, %v492_v60  ;;  %v268_v11 = vrot.slane %v266_v8, 5  ;;  %v276_v13 = vshll.u32 %v204_v52, 16 }
  0x2a   : > { %671 = vrot.lane.b32.xlu1 %v1801_v59, %s1581_s11  ;;  %v1290_v17 = vcombine.low %v454_v56, %v457_v2  ;;  %v464_v19 = vsel %vm1759_vm4, %v462_v62, %v463_v58  ;;  %v233_v23 = vshrl.u32 %v1772_v37, 16  ;;  %v236_v27 = vshll.u32 %v1772_v37, 16 }
  0x2b   : > { %v1825_v33 = vcombine.low %v461_v61, %v464_v19  ;;  %v269_v35 = vsel %vm1809_vm5, %v264_v54, %v268_v11  ;;  %v273_v7 = vor.u32 %v1728_v18, %v268_v11  ;;  %v278_v8 = vrot.slane %v276_v13, 5 }
  0x2c   : > { %663 = vrot.lane.b32.xlu0 %v1290_v17, %s1581_s11  ;;  %v235_v36 = vrot.slane %v233_v23, 4  ;;  %v238_v38 = vrot.slane %v236_v27, 5  ;;  %v242_v39 = vshll.u32 %v1778_v40, 16  ;;  %v246_v42 = vshrl.u32 %v1778_v40, 16 }
  0x2d   : > { %v274_v43 = vrot.slane %v273_v7, 4  ;;  %v252_v45 = vshll.u32 %v201_v41, 16  ;;  %v355_v46 = vrot.slane %v353_v5, 4  ;;  %v358_v47 = vrot.slane %v356_v6, 5 }
  0x2e   : > { %673 = vrot.lane.b32.xlu1 %v1815_v9, %s1581_s11  ;;  %v239_v18 = vor.u32 %v238_v38, %v235_v36  ;;  %v244_v48 = vrot.slane %v242_v39, 5  ;;  %v248_v50 = vrot.slane %v246_v42, 4  ;;  %v362_v51 = vshll.u32 %v1694_v1, 16 }
  0x2f   : > { %v279_v52 = vsel %vm1809_vm5, %v274_v43, %v278_v8  ;;  %v254_v53 = vrot.slane %v252_v45, 5  ;;  %v359_v54 = vor.u32 %v358_v47, %v355_v46  ;;  %v368_v41 = vrot.slane %v366_v3, 4  ;;  %v219_v8 = vld [vmem:[%s1688_s9 + $0x50] sm:$0x1] }
  0x30   : > { %665 = vrot.lane.b32.xlu0 %v1825_v33, %s1581_s11  ;;  %v1846_v0 = vcombine.low %v269_v35, %v279_v52  ;;  %v240_v5 = vrot.slane %v239_v18, 4  ;;  %v249_v6 = vor.u32 %v248_v50, %v244_v48  ;;  %v364_v55 = vrot.slane %v362_v51, 5  ;;  %v1876_v50 = vld [vmem:[%s1688_s9 + $0x20] sm:$0x1] }
  0x31   : > { %v360_v56 = vrot.slane %v359_v54, 4  ;;  %v372_v57 = vshll.u32 %v1792_v49, 16  ;;  %v329_v58 = vshrl.u32 %v1752_v30, 16  ;;  %v332_v60 = vshll.u32 %v1752_v30, 16 }
  0x32   : > { %625 = vrot.lane.b32.xlu1 %v1846_v0, %s1582_s20  ;;  %v245_v1 = vsel %vm1809_vm5, %v240_v5, %v244_v48  ;;  %v250_v3 = vrot.slane %v249_v6, 4  ;;  %v369_v61 = vor.u32 %v368_v41, %v364_v55  ;;  %v338_v62 = vshll.u32 %v1755_v31, 16 }
  0x33   : > { %v365_v2 = vsel %vm1809_vm5, %v360_v56, %v364_v55  ;;  %v374_v49 = vrot.slane %v372_v57, 5  ;;  %v331_v11 = vrot.slane %v329_v58, 4  ;;  %v334_v13 = vrot.slane %v332_v60, 5 }
  0x34   : > { %v255_v30 = vsel %vm1809_vm5, %v250_v3, %v254_v53  ;;  %v370_v17 = vrot.slane %v369_v61, 4  ;;  %v340_v19 = vrot.slane %v338_v62, 5  ;;  %v342_v23 = vshrl.u32 %v1755_v31, 16  ;;  %v1899_v61 = vld [vmem:[%s1688_s9 + $0x54] sm:$0xf] }
  0x35   : > { %v1282_v27 = vcombine.low %v245_v1, %v255_v30  ;;  %v335_v35 = vor.u32 %v334_v13, %v331_v11  ;;  %v348_v7 = vshll.u32 %v1767_v34, 16  ;;  %v379_v36 = vrot.slane %v377_v15, 4 }
  0x36   : > { %v375_v38 = vsel %vm1809_vm5, %v370_v17, %v374_v49  ;;  %v344_v39 = vrot.slane %v342_v23, 4  ;;  %v382_v42 = vrot.slane %v380_v16, 5  ;;  %v386_v43 = vshll.u32 %v1723_v14, 16  ;;  %v1910_v17 = vld [vmem:[%s1688_s9 + $0x58] sm:$0xf] }
  0x37   : > { %623 = vrot.lane.b32.xlu0 %v1282_v27, %s1582_s20  ;;  %v1871_v31 = vcombine.low %v365_v2, %v375_v38  ;;  %v336_v45 = vrot.slane %v335_v35, 4  ;;  %v350_v34 = vrot.slane %v348_v7, 5  ;;  %v392_v46 = vrot.slane %v390_v20, 4 }
  0x38   : > { %v345_v47 = vor.u32 %v344_v39, %v340_v19  ;;  %v383_v15 = vor.u32 %v382_v42, %v379_v36  ;;  %v388_v18 = vrot.slane %v386_v43, 5  ;;  %v396_v48 = vshll.u32 %v219_v8, 16 }
  0x39   : > { %633 = vrot.lane.b32.xlu1 %v1871_v31, %s1582_s20  ;;  %v341_v16 = vsel %vm1809_vm5, %v336_v45, %v340_v19  ;;  %v283_v51 = vrot.slane %v281_v25, 4  ;;  %v286_v52 = vrot.slane %v284_v26, 5  ;;  %v290_v20 = vshll.u32 %v1741_v24, 16 }
  0x3a   : > { %v346_v53 = vrot.slane %v345_v47, 4  ;;  %v384_v54 = vrot.slane %v383_v15, 4  ;;  %v393_v41 = vor.u32 %v392_v46, %v388_v18  ;;  %v398_v5 = vrot.slane %v396_v48, 5 }
  0x3b   : > { %v287_v6 = vor.u32 %v286_v52, %v283_v51  ;;  %v292_v55 = vrot.slane %v290_v20, 5  ;;  %v296_v56 = vrot.slane %v294_v28, 4  ;;  %v300_v57 = vshll.u32 %v1876_v50, 16  ;;  %v1950_v51 = vld [vmem:[%s1688_s9 + $0x2c] sm:$0x1] }
  0x3c   : > { %v351_v25 = vsel %vm1809_vm5, %v346_v53, %v350_v34  ;;  %v389_v26 = vsel %vm1809_vm5, %v384_v54, %v388_v18  ;;  %v394_v58 = vrot.slane %v393_v41, 4  ;;  %v1270_v2 = vrot.slane %v1717_v12, 9  ;;  %v1917_v12 = vld [vmem:[%s1688_s9 + $0x24] sm:$0xf]  ;;  %v1946_v18 = vld [vmem:[%s1688_s9 + $0x5c] sm:$0x1] }
  0x3d   : > { %v1894_v60 = vcombine.low %v341_v16, %v351_v25  ;;  %709 = vrot.lane.b32.xlu1 %v1871_v31, %s1583_s21  ;;  %v288_v1 = vrot.slane %v287_v6, 4  ;;  %v297_v3 = vor.u32 %v296_v56, %v292_v55  ;;  %v302_v28 = vrot.slane %v300_v57, 5 }
  0x3e   : > { %v399_v62 = vsel %vm1809_vm5, %v394_v58, %v398_v5  ;;  %v495_v49 = vrot.slane %v1723_v14, 5  ;;  %v498_v11 = vrot.slane %v219_v8, 5  ;;  %v467_v27 = vrot.slane %v1741_v24, 5  ;;  %v1925_v8 = vld [vmem:[%s1688_s9 + $0x28] sm:$0xf] }
  0x3f   : > { %631 = vrot.lane.b32.xlu0 %v1894_v60, %s1582_s20  ;;  %v1907_v13 = vcombine.low %v389_v26, %v399_v62  ;;  %v298_v30 = vrot.slane %v297_v3, 4  ;;  %v293_v19 = vsel %vm1809_vm5, %v288_v1, %v292_v55  ;;  %v401_v35 = vshrl.u32 %v1899_v61, 16 }
  0x40   : > { %v497_v23 = vrot.slane %v495_v49, 4  ;;  %v404_v7 = vshll.u32 %v1899_v61, 16  ;;  %v496_v36 = vsel %vm1759_vm4, %v1270_v2, %v495_v49  ;;  %v414_v38 = vshrl.u32 %v1910_v17, 16  ;;  %v1974_v2 = vld [vmem:[%s1688_s9 + $0x60] sm:$0xf] }
  0x41   : > { %711 = vrot.lane.b32.xlu1 %v1907_v13, %s1583_s21  ;;  %v303_v14 = vsel %vm1809_vm5, %v298_v30, %v302_v28  ;;  %v1266_v42 = vrot.slane %v1738_v22, 9  ;;  %v305_v43 = vshrl.u32 %v1917_v12, 16  ;;  %v308_v45 = vshll.u32 %v1917_v12, 16  ;;  %v1977_v30 = vld [vmem:[%s1688_s9 + $0x64] sm:$0xf] }
  0x42   : > { %v499_v24 = vsel %vm1759_vm4, %v497_v23, %v498_v11  ;;  %v1934_v39 = vcombine.low %v293_v19, %v303_v14  ;;  %v469_v34 = vrot.slane %v467_v27, 4  ;;  %v470_v46 = vrot.slane %v1876_v50, 5 }
  0x43   : > { %701 = vrot.lane.b32.xlu0 %v1846_v0, %s1583_s21  ;;  %v318_v47 = vshrl.u32 %v1925_v8, 16  ;;  %v403_v15 = vrot.slane %v401_v35, 4  ;;  %v1943_v0 = vcombine.low %v496_v36, %v499_v24  ;;  %v406_v48 = vrot.slane %v404_v7, 5  ;;  %v225_v24 = vld [vmem:[%s1688_s9 + $0x68] sm:$0x1] }
  0x44   : > { %v410_v22 = vshll.u32 %v1910_v17, 16  ;;  %v416_v16 = vrot.slane %v414_v38, 4  ;;  %v307_v52 = vrot.slane %v305_v43, 4  ;;  %v310_v20 = vrot.slane %v308_v45, 5 }
  0x45   : > { %728 = vrot.lane.b32.xlu1 %v1815_v9, %s1584_s24  ;;  %v314_v50 = vshll.u32 %v1925_v8, 16  ;;  %v468_v53 = vsel %vm1759_vm4, %v1266_v42, %v467_v27  ;;  %v407_v54 = vor.u32 %v406_v48, %v403_v15  ;;  %v320_v5 = vrot.slane %v318_v47, 4 }
  0x46   : > { %v412_v41 = vrot.slane %v410_v22, 5  ;;  %v471_v6 = vsel %vm1759_vm4, %v469_v34, %v470_v46  ;;  %v420_v55 = vshll.u32 %v1946_v18, 16  ;;  %v311_v56 = vor.u32 %v310_v20, %v307_v52  ;;  %v2010_v34 = vld [vmem:[%s1688_s9 + $0x6c] sm:$0xf] }
  0x47   : > { %703 = vrot.lane.b32.xlu0 %v1934_v39, %s1583_s21  ;;  %v1960_v57 = vrot.slane %v314_v50, 5  ;;  %v324_v26 = vshll.u32 %v1950_v51, 16  ;;  %v502_v58 = vrot.slane %v1910_v17, 5  ;;  %v1968_v1 = vcombine.low %v468_v53, %v471_v6  ;;  %v2020_v50 = vld [vmem:[%s1688_s9 + $0x70] sm:$0xf] }
  0x48   : > { %v417_v25 = vor.u32 %v416_v16, %v412_v41  ;;  %v408_v3 = vrot.slane %v407_v54, 4  ;;  %v1970_v28 = vrot.slane %v311_v56, 4  ;;  %v422_v11 = vrot.slane %v420_v55, 5 }
  0x49   : > { %730 = vrot.lane.b32.xlu1 %v1943_v0, %s1584_s24  ;;  %v321_v62 = vor.u32 %v320_v5, %v1960_v57  ;;  %v1987_v19 = vcombine.low %v1917_v12, %v1925_v8  ;;  %v1989_v23 = vrot.slane %v324_v26, 5  ;;  %v1271_v27 = vrot.slane %v1899_v61, 9 }
  0x4a   : > { %v418_v49 = vrot.slane %v417_v25, 4  ;;  %v1994_v35 = vrot.slane %v502_v58, 4  ;;  %v505_v14 = vrot.slane %v1946_v18, 5  ;;  %v508_v7 = vshrl.u32 %v1974_v2, 16 }
  0x4b   : > { %720 = vrot.lane.b32.xlu0 %v1825_v33, %s1584_s24  ;;  %v1983_v33 = vcombine.low %v1899_v61, %v1910_v17  ;;  %v511_v36 = vshll.u32 %v1974_v2, 16  ;;  %v413_v38 = vsel %vm1809_vm5, %v408_v3, %v412_v41  ;;  %v317_v42 = vsel %vm1809_vm5, %v1970_v28, %v1960_v57  ;;  %v1483_v17 = vld [vmem:[%s2368_s1 + $0x8] sm:$0x3f]  }
  0x4c   : > { %v322_v43 = vrot.slane %v321_v62, 4  ;;  %v521_v45 = vshrl.u32 %v1977_v30, 16  ;;  %v423_v46 = vsel %vm1809_vm5, %v418_v49, %v422_v11  ;;  %v510_v47 = vrot.slane %v508_v7, 4  ;;  %v228_v62 = vld [vmem:[%s1688_s9 + $0x74] sm:$0x1]  ;;  %s1488_s9 = sshll.u32 %s1589_s7, 4  ;;  %s1489_s9 = int_to_ptr.vmem [resolvable:$false] %s1488_s9 }
  0x4d   : > { %747 = vrot.lane.b32.xlu1 %v1735_v21, %s1585_s27  ;;  %v513_v15 = vrot.slane %v511_v36, 5  ;;  %v517_v48 = vshll.u32 %v1977_v30, 16  ;;  %v527_v16 = vshll.u32 %v225_v24, 16  ;;  %v1272_v52 = vrot.slane %v1974_v2, 9 }
  0x4e   : > { %v523_v22 = vrot.slane %v521_v45, 4  ;;  %v536_v20 = vrot.slane %v1977_v30, 5  ;;  %v539_v41 = vrot.slane %v225_v24, 5  ;;  %v542_v5 = vshrl.u32 %v2010_v34, 16  ;;  %v1482_v24 = vld [vmem:[%s2368_s1] sm:$0xff]  }
  0x4f   : > { %722 = vrot.lane.b32.xlu0 %v1968_v1, %s1584_s24  ;;  %v514_v53 = vor.u32 %v513_v15, %v510_v47  ;;  %v519_v54 = vrot.slane %v517_v48, 5  ;;  %v2025_v6 = vcombine.low %v413_v38, %v423_v46  ;;  %v545_v57 = vshll.u32 %v2010_v34, 16  ;;  %1365 = vmatprep.subr.bf16.mxu0 %v1482_v24 }
  0x50   : > { %v537_v55 = vsel %vm1759_vm4, %v1272_v52, %v536_v20  ;;  %v538_v56 = vrot.slane %v536_v20, 4  ;;  %v529_v3 = vrot.slane %v527_v16, 5  ;;  %v555_v28 = vshrl.u32 %v2020_v50, 16  ;;  %1385 = vmatprep.subr.bf16.mxu1 %v1482_v24  ;;  %1366 = vmatpush3.bf16.msra.mxu0 %v1482_v24 }
  0x51   : > { %749 = vrot.lane.b32.xlu1 %v1983_v33, %s1585_s27  ;;  %v515_v25 = vrot.slane %v514_v53, 4  ;;  %v524_v26 = vor.u32 %v523_v22, %v519_v54  ;;  %v544_v11 = vrot.slane %v542_v5, 4  ;;  %v547_v7 = vrot.slane %v545_v57, 5  ;;  %1387 = vmatpush3.bf16.msra.mxu1 %v1482_v24 }
  0x52   : > { %v540_v49 = vsel %vm1759_vm4, %v538_v56, %v539_v41  ;;  %v551_v36 = vshll.u32 %v2020_v50, 16  ;;  %v557_v47 = vrot.slane %v555_v28, 4  ;;  %v561_v22 = vshll.u32 %v228_v62, 16 }
  0x53   : > { %739 = vrot.lane.b32.xlu0 %v1749_v29, %s1585_s27  ;;  %v520_v38 = vsel %vm1809_vm5, %v515_v25, %v519_v54  ;;  %v525_v45 = vrot.slane %v524_v26, 4  ;;  %v2042_v46 = vcombine.low %v537_v55, %v540_v49  ;;  %v548_v15 = vor.u32 %v547_v7, %v544_v11 }
  0x54   : > { %v553_v48 = vrot.slane %v551_v36, 5  ;;  %v1273_v16 = vrot.slane %v2010_v34, 9  ;;  %v327_v52 = vsel %vm1809_vm5, %v322_v43, %v1989_v23  ;;  %v570_v53 = vrot.slane %v2020_v50, 5 }
  0x55   : > { %766 = vrot.lane.b32.xlu1 %v1907_v13, %s1586_s28  ;;  %v530_v20 = vsel %vm1809_vm5, %v525_v45, %v529_v3  ;;  %v573_v54 = vrot.slane %v228_v62, 5  ;;  %v549_v5 = vrot.slane %v548_v15, 4  ;;  %v563_v56 = vrot.slane %v561_v22, 5 }
  0x56   : > { %v2055_v41 = vcombine.low %v520_v38, %v530_v20  ;;  %v558_v55 = vor.u32 %v557_v47, %v553_v48  ;;  %v2059_v23 = vsel %vm1759_vm4, %v1273_v16, %v570_v53  ;;  %v572_v43 = vrot.slane %v570_v53, 4 }
  0x57   : > { %741 = vrot.lane.b32.xlu0 %v1987_v19, %s1585_s27  ;;  %v1274_v57 = vcombine.low %v1772_v37, %v1778_v40  ;;  %v1285_v25 = vcombine.low %v317_v42, %v327_v52  ;;  %v554_v26 = vsel %vm1809_vm5, %v549_v5, %v553_v48  ;;  %v474_v28 = vrot.slane %v1925_v8, 5 }
  0x58   : > { %v559_v3 = vrot.slane %v558_v55, 4  ;;  %v2070_v62 = vsel %vm1759_vm4, %v572_v43, %v573_v54  ;;  %v503_v42 = vsel %vm1759_vm4, %v1271_v27, %v502_v58  ;;  %v506_v8 = vsel %vm1759_vm4, %v1994_v35, %v505_v14 }
  0x59   : > { %768 = vrot.lane.b32.xlu1 %v2025_v6, %s1586_s28  ;;  %v1303_v11 = vcombine.low %v2059_v23, %v2070_v62  ;;  %v1588_v18 = vmov 65535   ;;  %v1267_v27 = vrot.slane %v1917_v12, 9  ;;  %v476_v35 = vrot.slane %v474_v28, 4 }
  0x5a   : > { %v564_v49 = vsel %vm1809_vm5, %v559_v3, %v563_v56  ;;  %v978_v58 = vsel %vm976_vm6, 4294967295, %v1588_v18  ;;  %v477_v63 = vrot.slane %v1950_v51, 5  ;;  %v1297_v7 = vcombine.low %v503_v42, %v506_v8 }
  0x5b   : > { %758 = vrot.lane.b32.xlu0 %v1934_v39, %s1586_s28  ;;  %v1302_v61 = vcombine.low %v554_v26, %v564_v49  ;;  %v979_v14 = vsel %vm977_vm7, %v978_v58, 0  ;;  %v475_v24 = vsel %vm1759_vm4, %v1267_v27, %v474_v28  ;;  %v1298_v32 = vcombine.low %v1974_v2, %v1977_v30 }
  0x5c   : > { %v981_v36 = vand.u32 %v1483_v17, %v979_v14  ;;  %v478_v38 = vsel %vm1759_vm4, %v476_v35, %v477_v63  ;;  %v1301_v12 = vcombine.low %v2010_v34, %v2020_v50 }
  0x5d   : > { %785 = vrot.lane.b32.xlu1 %v1943_v0, %s1587_s5 }
  0x5e   : > { %1367 = vmatprep.subr.bf16.mxu0 %v981_v36  ;;  %1386 = vmatprep.subr.bf16.mxu1 %v981_v36 }
  0x5f   : > { %760 = vrot.lane.b32.xlu0 %v1285_v25, %s1586_s28  ;;  %1368 = vmatpush3.bf16.msra.mxu0 %v981_v36 }
  0x60   : > { %1388 = vmatpush3.bf16.msra.mxu1 %v981_v36 }
  0x61   : > { %635 = vrot.lane.b32.xlu1 %v1907_v13, %s1582_s20  ;;  %v1293_v13 = vcombine.low %v475_v24, %v478_v38 }
  0x63   : > { %777 = vrot.lane.b32.xlu0 %v1968_v1, %s1587_s5 }
  0x65   : > { %787 = vrot.lane.b32.xlu1 %v1297_v7, %s1587_s5 }
  0x67   : > { %627 = vrot.lane.b32.xlu0 %v1934_v39, %s1582_s20 }
  0x69   : > { %637 = vrot.lane.b32.xlu1 %v2025_v6, %s1582_s20 }
  0x6b   : > { %779 = vrot.lane.b32.xlu0 %v1293_v13, %s1587_s5 }
  0x6d   : > { %675 = vrot.lane.b32.xlu1 %v1943_v0, %s1581_s11 }
  0x6f   : > { %629 = vrot.lane.b32.xlu0 %v1285_v25, %s1582_s20 }
  0x71   : > { %677 = vrot.lane.b32.xlu1 %v1297_v7, %s1581_s11 }
  0x73   : > { %667 = vrot.lane.b32.xlu0 %v1968_v1, %s1581_s11 }
  0x75   : > { %694 = vrot.lane.b32.xlu1 %v1983_v33, %s1580_s10 }
  0x77   : > { %669 = vrot.lane.b32.xlu0 %v1293_v13, %s1581_s11  ;;  %s1261_s11 = sshll.u32 %s185_s8, 6 }
  0x78   : > { %s2257_s20 = scalar_lea.vmem [#allocation2], %s1261_s11 }
  0x79   : > { %696 = vrot.lane.b32.xlu1 %v1298_v32, %s1580_s10 }
  0x7b   : > { %686 = vrot.lane.b32.xlu0 %v1987_v19, %s1580_s10 }
  0x7d   : > { %713 = vrot.lane.b32.xlu1 %v2025_v6, %s1583_s21 }
  0x7f   : > { %688 = vrot.lane.b32.xlu0 %v1786_v44, %s1580_s10  ;;  %s1490_s10 = scalar_lea.vmem %s1489_s9, 2048 }
  0x81   : > { %715 = vrot.lane.b32.xlu1 %v2055_v41, %s1583_s21 }
  0x83   : > { %705 = vrot.lane.b32.xlu0 %v1285_v25, %s1583_s21 }
  0x85   : > { %732 = vrot.lane.b32.xlu1 %v1297_v7, %s1584_s24 }
  0x87   : > { %707 = vrot.lane.b32.xlu0 %v1894_v60, %s1583_s21  ;;  %s1354_s21 = sshll.u32 %s1562_s15, 4 }
  0x89   : > { %734 = vrot.lane.b32.xlu1 %v2042_v46, %s1584_s24 }
  0x8b   : > { %724 = vrot.lane.b32.xlu0 %v1293_v13, %s1584_s24 }
  0x8d   : > { %751 = vrot.lane.b32.xlu1 %v1298_v32, %s1585_s27 }
  0x8f   : > { %726 = vrot.lane.b32.xlu0 %v1801_v59, %s1584_s24  ;;  %s1334_s24 = sshll.u32 %s1566_s16, 5  ;;  %s1178_s16 = sshll.u32 %s2257_s20, 4  ;;  %s2305_s16 = int_to_ptr.vmem [resolvable:$true] %s1178_s16 }
  0x90   : > { %s1484_s6 = scalar_lea.vmem %s2305_s16, 1024  ;;  %p1491_p2 = scmp.lt.s32.totalorder %s2305_s16, %s1489_s9 }
  0x91   : > { %753 = vrot.lane.b32.xlu1 %v1301_v12, %s1585_s27  ;;  %v691_v39 = vpop.permute.xlu1 %690  ;;  %p1485_p13 = scmp.ne.s32.totalorder %s2305_s16, %s1484_s6  ;;  %p1492_p4 = scmp.lt.s32.totalorder %s1490_s10, %s1484_s6 }
  0x92   : > { %v683_v0 = vpop.permute.xlu0 %682 }
  0x93   : > { %743 = vrot.lane.b32.xlu0 %v1786_v44, %s1585_s27  ;;  %p1486_p0 = pnand %p1485_p13, %p1663_p3  ;;  %p1493_p5 = por %p1492_p4, %p1491_p2 }
  0x95   : > { %770 = vrot.lane.b32.xlu1 %v2055_v41, %s1586_s28  ;;  %v693_v51 = vpop.permute.xlu1 %692  ;;  %p1487_p1 = pneg %p1486_p0 }
  0x96   : > { %v2149_v1 = vpop.permute.xlu0 %684 }
  0x97   : > { %745 = vrot.lane.b32.xlu0 %v1702_v4, %s1585_s27  ;;  %s1175_s27 = sadd.s32 %s1354_s21, %s1334_s24  ;;  %p1494_p6 = pnand %p1493_p5, %p1487_p1 }
  0x98   : > { %s1335_s15 = sshll.u32 %s1175_s27, 6 }
  0x99   : > { %772 = vrot.lane.b32.xlu1 %v1302_v61, %s1586_s28  ;;  %s2303_s4 = scalar_lea.hbm %s2370_s3, %s1335_s15 }
  0x9b   : > { %762 = vrot.lane.b32.xlu0 %v1894_v60, %s1586_s28 }
  0x9c   : > { %v672_v2 = vpop.permute.xlu1 %671 }
  0x9d   : > { %789 = vrot.lane.b32.xlu1 %v2042_v46, %s1587_s5 }
  0x9e   : > { %v664_v30 = vpop.permute.xlu0 %663 }
  0x9f   : > { %764 = vrot.lane.b32.xlu0 %v1871_v31, %s1586_s28 }
  0xa0   : > { %v674_v34 = vpop.permute.xlu1 %673 }
  0xa1   : > { %791 = vrot.lane.b32.xlu1 %v1303_v11, %s1587_s5 }
  0xa2   : > { %v666_v50 = vpop.permute.xlu0 %665 }
  0xa3   : > { %781 = vrot.lane.b32.xlu0 %v1801_v59, %s1587_s5 }
  0xa4   : > { %v626_v6 = vpop.permute.xlu1 %625 }
  0xa5   : > { %v799_v11 = vsel %vm793_vm8, %v1713_v10, %v626_v6 }
  0xa6   : > { %v822_v7 = vsel %vm818_vm9, %v799_v11, %v666_v50 }
  0xa7   : > { %783 = vrot.lane.b32.xlu0 %v1815_v9, %s1587_s5  ;;  %v839_v32 = vsel %vm835_vm10, %v822_v7, %v2149_v1  ;;  %s2315_s5 = scalar_lea.sflag [#allocation3], %s185_s8 }
  0xa9   : > { %v624_v60 = vpop.permute.xlu0 %623 }
  0xaa   : > { %v796_v23 = vsel %vm793_vm8, %v1274_v57, %v624_v60 }
  0xab   : > { %v634_v45 = vpop.permute.xlu1 %633  ;;  %v820_v28 = vsel %vm818_vm9, %v796_v23, %v664_v30 }
  0xac   : > { %v811_v25 = vsel %vm793_vm8, %v1702_v4, %v634_v45  ;;  %v837_v8 = vsel %vm835_vm10, %v820_v28, %v683_v0 }
  0xad   : > { %v830_v57 = vsel %vm818_vm9, %v811_v25, %v674_v34 }
  0xae   : > { %v847_v17 = vsel %vm835_vm10, %v830_v57, %v693_v51 }
  0xaf   : > { %v710_v47 = vpop.permute.xlu1 %709 }
  0xb1   : > { %v632_v15 = vpop.permute.xlu0 %631 }
  0xb2   : > { %v808_v59 = vsel %vm793_vm8, %v1786_v44, %v632_v15 }
  0xb3   : > { %v712_v46 = vpop.permute.xlu1 %711  ;;  %v828_v9 = vsel %vm818_vm9, %v808_v59, %v672_v2 }
  0xb4   : > { %v845_v55 = vsel %vm835_vm10, %v828_v9, %v691_v39  ;;  %v864_v58 = vsel %vm852_vm11, %v847_v17, %v712_v46 }
  0xb5   : > { %v702_v48 = vpop.permute.xlu0 %701  ;;  %v862_v44 = vsel %vm852_vm11, %v845_v55, %v710_v47 }
  0xb6   : > { %v854_v4 = vsel %vm852_vm11, %v837_v8, %v702_v48 }
  0xb7   : > { %v729_v22 = vpop.permute.xlu1 %728 }
  0xb8   : > { %v879_v26 = vsel %vm869_vm12, %v862_v44, %v729_v22 }
  0xb9   : > { %v704_v31 = vpop.permute.xlu0 %703 }
  0xba   : > { %v856_v39 = vsel %vm852_vm11, %v839_v32, %v704_v31 }
  0xbb   : > { %v731_v16 = vpop.permute.xlu1 %730 }
  0xbc   : > { %v881_v35 = vsel %vm869_vm12, %v864_v58, %v731_v16 }
  0xbd   : > { %v721_v52 = vpop.permute.xlu0 %720 }
  0xbe   : > { %v871_v61 = vsel %vm869_vm12, %v854_v4, %v721_v52 }
  0xbf   : > { %v748_v20 = vpop.permute.xlu1 %747 }
  0xc0   : > { %v896_v62 = vsel %vm886_vm13, %v879_v26, %v748_v20 }
  0xc1   : > { %v723_v53 = vpop.permute.xlu0 %722 }
  0xc2   : > { %v873_v0 = vsel %vm869_vm12, %v856_v39, %v723_v53 }
  0xc3   : > { %v750_v54 = vpop.permute.xlu1 %749 }
  0xc4   : > { %v898_v36 = vsel %vm886_vm13, %v881_v35, %v750_v54 }
  0xc5   : > { %v740_v41 = vpop.permute.xlu0 %739 }
  0xc6   : > { %v888_v27 = vsel %vm886_vm13, %v871_v61, %v740_v41 }
  0xc7   : > { %v767_v5 = vpop.permute.xlu1 %766 }
  0xc8   : > { %v913_v37 = vsel %vm903_vm14, %v896_v62, %v767_v5 }
  0xc9   : > { %v742_v56 = vpop.permute.xlu0 %741 }
  0xca   : > { %v890_v2 = vsel %vm886_vm13, %v873_v0, %v742_v56 }
  0xcb   : > { %v769_v43 = vpop.permute.xlu1 %768 }
  0xcc   : > { %v915_v24 = vsel %vm903_vm14, %v898_v36, %v769_v43 }
  0xcd   : > { %v759_v3 = vpop.permute.xlu0 %758 }
  0xce   : > { %v905_v63 = vsel %vm903_vm14, %v888_v27, %v759_v3 }
  0xcf   : > { %v786_v40 = vpop.permute.xlu1 %785 }
  0xd0   : > { %v930_v42 = vsel %vm920_vm15, %v913_v37, %v786_v40 }
  0xd1   : > { %v761_v49 = vpop.permute.xlu0 %760  ;;  %1377 = vmatprep.mubr.msk.bf16.mxu1 %vm959_vm0, %v930_v42 }
  0xd2   : > { %v907_v30 = vsel %vm903_vm14, %v890_v2, %v761_v49 }
  0xd3   : > { %v636_v18 = vpop.permute.xlu1 %635 }
  0xd4   : > { %v814_v23 = vsel %vm793_vm8, %v1735_v21, %v636_v18 }
  0xd5   : > { %v778_v14 = vpop.permute.xlu0 %777 }
  0xd6   : > { %v922_v10 = vsel %vm920_vm15, %v905_v63, %v778_v14 }
  0xd7   : > { %1369 = vmatprep.mubr.msk.bf16.mxu0 %vm959_vm0, %v922_v10  ;;  %v788_v38 = vpop.permute.xlu1 %787 }
  0xd8   : > { %v932_v13 = vsel %vm920_vm15, %v915_v24, %v788_v38 }
  0xd9   : > { %v628_v12 = vpop.permute.xlu0 %627  ;;  %1378 = vmatmul.mubr.msk.bf16.vlgmr.msra.gmra.mrb[0].mxu1 %vm959_vm0, %v932_v13 }
  0xda   : > { %v802_v21 = vsel %vm793_vm8, %v1749_v29, %v628_v12 }
  0xdb   : > { %v638_v51 = vpop.permute.xlu1 %637 }
  0xdc   : > { %v817_v28 = vsel %vm793_vm8, %v1983_v33, %v638_v51 }
  0xdd   : > { %v780_v34 = vpop.permute.xlu0 %779 }
  0xde   : > { %v924_v50 = vsel %vm920_vm15, %v907_v30, %v780_v34  ;;  %v2249_v30 = vld [vmem:[%s2369_s2] ss:$0 sm:$0xff] }
  0xdf   : > { %1370 = vmatmul.mubr.msk.bf16.vlgmr.msra.gmra.mrb[0].mxu0 %vm959_vm0, %v924_v50  ;;  %v676_v6 = vpop.permute.xlu1 %675 }
  0xe0   : > { %v832_v44 = vsel %vm818_vm9, %v814_v23, %v676_v6 }
  0xe1   : > { %v630_v60 = vpop.permute.xlu0 %629 }
  0xe2   : > { %v805_v27 = vsel %vm793_vm8, %v1987_v19, %v630_v60 }
  0xe3   : > { %v678_v1 = vpop.permute.xlu1 %677 }
  0xe4   : > { %v834_v40 = vsel %vm818_vm9, %v817_v28, %v678_v1 }
  0xe5   : > { %v668_v45 = vpop.permute.xlu0 %667 }
  0xe6   : > { %v824_v4 = vsel %vm818_vm9, %v802_v21, %v668_v45 }
  0xe7   : > { %v695_v47 = vpop.permute.xlu1 %694 }
  0xe8   : > { %v849_v25 = vsel %vm835_vm10, %v832_v44, %v695_v47 }
  0xe9   : > { %v670_v15 = vpop.permute.xlu0 %669 }
  0xea   : > { %v826_v7 = vsel %vm818_vm9, %v805_v27, %v670_v15 }
  0xeb   : > { %v697_v46 = vpop.permute.xlu1 %696 }
  0xec   : > { %v851_v42 = vsel %vm835_vm10, %v834_v40, %v697_v46 }
  0xed   : > { %v687_v48 = vpop.permute.xlu0 %686 }
  0xee   : > { %v841_v17 = vsel %vm835_vm10, %v824_v4, %v687_v48 }
  0xef   : > { %v714_v22 = vpop.permute.xlu1 %713 }
  0xf0   : > { %v866_v3 = vsel %vm852_vm11, %v849_v25, %v714_v22 }
  0xf1   : > { %v689_v31 = vpop.permute.xlu0 %688 }
  0xf2   : > { %v843_v24 = vsel %vm835_vm10, %v826_v7, %v689_v31 }
  0xf3   : > { %v716_v16 = vpop.permute.xlu1 %715 }
  0xf4   : > { %v868_v11 = vsel %vm852_vm11, %v851_v42, %v716_v16 }
  0xf5   : > { %v706_v52 = vpop.permute.xlu0 %705 }
  0xf6   : > { %v858_v29 = vsel %vm852_vm11, %v841_v17, %v706_v52 }
  0xf7   : > { %v733_v20 = vpop.permute.xlu1 %732 }
  0xf8   : > { %v883_v62 = vsel %vm869_vm12, %v866_v3, %v733_v20 }
  0xf9   : > { %v708_v53 = vpop.permute.xlu0 %707 }
  0xfa   : > { %v860_v19 = vsel %vm852_vm11, %v843_v24, %v708_v53 }
  0xfb   : > { %v735_v59 = vpop.permute.xlu1 %734 }
  0xfc   : > { %v885_v61 = vsel %vm869_vm12, %v868_v11, %v735_v59 }
  0xfd   : > { %v725_v54 = vpop.permute.xlu0 %724 }
  0xfe   : > { %v875_v35 = vsel %vm869_vm12, %v858_v29, %v725_v54 }
  0xff   : > { %v752_v41 = vpop.permute.xlu1 %751 }
 0x100   : > { %v900_v57 = vsel %vm886_vm13, %v883_v62, %v752_v41 }
 0x101   : > { %v727_v9 = vpop.permute.xlu0 %726 }
 0x102   : > { %v877_v12 = vsel %vm869_vm12, %v860_v19, %v727_v9 }
 0x103   : > { %v754_v5 = vpop.permute.xlu1 %753 }
 0x104   : > { %v902_v58 = vsel %vm886_vm13, %v885_v61, %v754_v5 }
 0x105   : > { %v744_v55 = vpop.permute.xlu0 %743 }
 0x106   : > { %v892_v36 = vsel %vm886_vm13, %v875_v35, %v744_v55 }
 0x107   : > { %v771_v56 = vpop.permute.xlu1 %770 }
 0x108   : > { %v917_v8 = vsel %vm903_vm14, %v900_v57, %v771_v56 }
 0x109   : > { %v746_v43 = vpop.permute.xlu0 %745 }
 0x10a   : > { %v894_v39 = vsel %vm886_vm13, %v877_v12, %v746_v43 }
 0x10b   : > { %v773_v26 = vpop.permute.xlu1 %772 }
 0x10c   : > { %v919_v63 = vsel %vm903_vm14, %v902_v58, %v773_v26 }
 0x10d   : > { %v763_v37 = vpop.permute.xlu0 %762 }
 0x10e   : > { %v909_v38 = vsel %vm903_vm14, %v892_v36, %v763_v37 }
 0x10f   : > { %v790_v49 = vpop.permute.xlu1 %789 }
 0x110   : > { %v934_v33 = vsel %vm920_vm15, %v917_v8, %v790_v49 }
 0x111   : > { %v765_v18 = vpop.permute.xlu0 %764  ;;  %1381 = vmatprep.mubr.msk.bf16.mxu1 %vm959_vm0, %v934_v33 }
 0x112   : > { %v911_v0 = vsel %vm903_vm14, %v894_v39, %v765_v18 }
 0x113   : > { %v792_v14 = vpop.permute.xlu1 %791 }
 0x114   : > { %v936_v10 = vsel %vm920_vm15, %v919_v63, %v792_v14 }
 0x115   : > { %v782_v13 = vpop.permute.xlu0 %781  ;;  %1382 = vmatmul.mubr.msk.bf16.gmra.mrb[4].mxu1 %vm959_vm0, %v936_v10 }
 0x116   : > { %v926_v32 = vsel %vm920_vm15, %v909_v38, %v782_v13 }
 0x117   : > { %1373 = vmatprep.mubr.msk.bf16.mxu0 %vm959_vm0, %v926_v32 }
 0x119   : > { %v784_v51 = vpop.permute.xlu0 %783 }
 0x11a   : > { %v928_v2 = vsel %vm920_vm15, %v911_v0, %v784_v51 }
 0x11b   : > { %1374 = vmatmul.mubr.msk.bf16.gmra.mrb[4].mxu0 %vm959_vm0, %v928_v2 }
 0x1ac   : > { %v1379_v34 = vpop.f32.mrb[0].mxu1 }
 0x1ad   : > { %v1058_v50 = vadd.f32 %v1379_v34, %v2249_v30  ;;  %v1049_v6 = vpop.f32.mrb[1].mxu1 }
 0x1ae   : > { %v1050_v60 = vadd.f32 %v2249_v30, %v1049_v6  ;;  %v1380_v1 = vpop.f32.mrb[2].mxu1 }
 0x1af   : > { %v1348_v45 = vpack.c.bf16 %v1058_v50, %v1058_v50  ;;  %v1061_v47 = vadd.f32 %v1380_v1, %v2249_v30  ;;  %v1052_v15 = vpop.f32.mrb[3].mxu1 }
 0x1b0   : > { %v1346_v46 = vpack.c.bf16 %v1050_v60, %v1050_v60  ;;  %v1053_v48 = vadd.f32 %v2249_v30, %v1052_v15 }
 0x1b1   : > { %1155 = vst.msk [vmem:[%s2257_s20 + $0x28] sm:$0xf] %vm1144_vm1, %v1348_v45  ;;  %v1349_v22 = vpack.c.bf16 %v1061_v47, %v1061_v47 }
 0x1b2   : > { %v1371_v31 = vpop.f32.mrb[0].mxu0  ;;  %1153 = vst.msk [vmem:[%s2257_s20 + $0x20] sm:$0xf] %vm1144_vm1, %v1346_v46  ;;  %v1347_v16 = vpack.c.bf16 %v1053_v48, %v1053_v48 }
 0x1b3   : > { %v1026_v52 = vadd.f32 %v1371_v31, %v2249_v30  ;;  %v1017_v20 = vpop.f32.mrb[1].mxu0  ;;  %1156 = vst.msk [vmem:[%s2257_s20 + $0x2c] sm:$0xf] %vm1144_vm1, %v1349_v22 }
 0x1b4   : > { %v1018_v53 = vadd.f32 %v2249_v30, %v1017_v20  ;;  %v1372_v59 = vpop.f32.mrb[2].mxu0  ;;  %1154 = vst.msk [vmem:[%s2257_s20 + $0x24] sm:$0xf] %vm1144_vm1, %v1347_v16 }
 0x1b5   : > { %v1340_v54 = vpack.c.bf16 %v1026_v52, %v1026_v52  ;;  %v1029_v41 = vadd.f32 %v1372_v59, %v2249_v30  ;;  %v1020_v9 = vpop.f32.mrb[3].mxu0 }
 0x1b6   : > { %v1338_v5 = vpack.c.bf16 %v1018_v53, %v1018_v53  ;;  %v1021_v55 = vadd.f32 %v2249_v30, %v1020_v9 }
 0x1b7   : > { %1147 = vst.msk [vmem:[%s2257_s20 + $0x8] sm:$0xf] %vm1144_vm1, %v1340_v54  ;;  %v1341_v56 = vpack.c.bf16 %v1029_v41, %v1029_v41 }
 0x1b8   : > { %1145 = vst.msk [vmem:[%s2257_s20] sm:$0xf] %vm1144_vm1, %v1338_v5  ;;  %v1339_v23 = vpack.c.bf16 %v1021_v55, %v1021_v55 }
 0x1b9   : > { %1148 = vst.msk [vmem:[%s2257_s20 + $0xc] sm:$0xf] %vm1144_vm1, %v1341_v56 }
 0x1ba   : > { %1146 = vst.msk [vmem:[%s2257_s20 + $0x4] sm:$0xf] %vm1144_vm1, %v1339_v23 }
 0x1e8   : > { %v1383_v43 = vpop.f32.mrb[4].mxu1 }
 0x1e9   : > { %v1074_v44 = vadd.f32 %v1383_v43, %v2249_v30  ;;  %v1065_v25 = vpop.f32.mrb[5].mxu1 }
 0x1ea   : > { %v1066_v26 = vadd.f32 %v2249_v30, %v1065_v25  ;;  %v1384_v3 = vpop.f32.mrb[6].mxu1 }
 0x1eb   : > { %v1352_v28 = vpack.c.bf16 %v1074_v44, %v1074_v44  ;;  %v1077_v62 = vadd.f32 %v1384_v3, %v2249_v30  ;;  %v1068_v37 = vpop.f32.mrb[7].mxu1 }
 0x1ec   : > { %v1350_v40 = vpack.c.bf16 %v1066_v26, %v1066_v26  ;;  %v1069_v57 = vadd.f32 %v2249_v30, %v1068_v37 }
 0x1ed   : > { %1159 = vst.msk [vmem:[%s2257_s20 + $0x38] sm:$0xf] %vm1144_vm1, %v1352_v28  ;;  %v1353_v21 = vpack.c.bf16 %v1077_v62, %v1077_v62 }
 0x1ee   : > { %v1375_v42 = vpop.f32.mrb[4].mxu0  ;;  %1157 = vst.msk [vmem:[%s2257_s20 + $0x30] sm:$0xf] %vm1144_vm1, %v1350_v40  ;;  %v1351_v8 = vpack.c.bf16 %v1069_v57, %v1069_v57 }
 0x1ef   : > { %v1042_v49 = vadd.f32 %v1375_v42, %v2249_v30  ;;  %v1033_v4 = vpop.f32.mrb[5].mxu0  ;;  %1160 = vst.msk [vmem:[%s2257_s20 + $0x3c] sm:$0xf] %vm1144_vm1, %v1353_v21 }
 0x1f0   : > { %v1034_v11 = vadd.f32 %v2249_v30, %v1033_v4  ;;  %v1376_v33 = vpop.f32.mrb[6].mxu0  ;;  %1158 = vst.msk [vmem:[%s2257_s20 + $0x34] sm:$0xf] %vm1144_vm1, %v1351_v8 }
 0x1f1   : > { %v1344_v17 = vpack.c.bf16 %v1042_v49, %v1042_v49  ;;  %v1045_v61 = vadd.f32 %v1376_v33, %v2249_v30  ;;  %v1036_v18 = vpop.f32.mrb[7].mxu0 }
 0x1f2   : > { %v1342_v29 = vpack.c.bf16 %v1034_v11, %v1034_v11  ;;  %v1037_v58 = vadd.f32 %v2249_v30, %v1036_v18 }
 0x1f3   : > { %1151 = vst.msk [vmem:[%s2257_s20 + $0x18] sm:$0xf] %vm1144_vm1, %v1344_v17  ;;  %v1345_v27 = vpack.c.bf16 %v1045_v61, %v1045_v61 }
 0x1f4   : > { %1149 = vst.msk [vmem:[%s2257_s20 + $0x10] sm:$0xf] %vm1144_vm1, %v1342_v29  ;;  %v1343_v35 = vpack.c.bf16 %v1037_v58, %v1037_v58 }
 0x1f5   : > { %1152 = vst.msk [vmem:[%s2257_s20 + $0x1c] sm:$0xf] %vm1144_vm1, %v1345_v27 }
 0x1f6   : > { %1150 = vst.msk [vmem:[%s2257_s20 + $0x14] sm:$0xf] %vm1144_vm1, %v1343_v35 }
 0x1f7   : > { %1497 = shalt.err (!%p1494_p6)
}
 0x1f8   : > { %s1498_s8 = scalar_lea.hbm %s2303_s4, 1024  ;;  %s1502_s21 = scalar_lea.hbm %s2370_s3, 4096 }
 0x1f9   : > { %p1499_p7 = scmp.ne.s32.totalorder %s2303_s4, %s1498_s8  ;;  %p1503_p11 = scmp.lt.u32.totalorder %s2303_s4, %s2370_s3 }
 0x1fa   : > { %p1504_p12 = scmp.lt.u32.totalorder %s1502_s21, %s1498_s8  ;;  %p1506_p0 = scmp.lt.u32.totalorder %s1498_s8, %s2303_s4 }
 0x1fb   : > { %p1500_p9 = pnand %p1499_p7, %p1663_p3 }
 0x1fc   : > { %p1505_p13 = por %p1504_p12, %p1503_p11 }
 0x1fd   : > { %p1501_p10 = pneg %p1500_p9 }
 0x1fe   : > { %p1507_p1 = por %p1506_p0, %p1505_p13 }
 0x200   : > { %p1508_p2 = pnand %p1507_p1, %p1501_p10 }
 0x202   : > { %1511 = shalt.err (!%p1508_p2)
}
 0x203   : > { %s1590_s15 = smov 64   ;;  %s1591_s28 = smov 4  }
 0x204   : > { %1390 = dma.vmem_to_hbm [thread:$0]  (%p1663_p3), %s2305_s16, 1024, %s2303_s4, %s2315_s5, %s1590_s15, %s1590_s15, %s1591_s28  }
 0x205 PF: > { %p1396_p4 = scmp.ge.s32.totalorder %s1578_s19, 2  ;;  %s1193_s29 = sand.u32 1, %s1550_s12  }
 0x206   : > { %s1194_s6 = scalar_lea.sflag [#allocation3], %s1193_s29 }
 0x207   : > { %p1393_p5 = pnand %p1396_p4, %p1672_p8 }
 0x209   : > { %1545 = dma.done.wait (!%p1393_p5), %s1194_s6, 1024  }
 0x20a   : > { %1547 = vsyncadd (!%p1393_p5), %s1194_s6, 4294966272  ;;  %s16_s19 = sadd.s32 1, %s1578_s19   ;;  %s2377_s12 = smov %s1554_s13 }
 0x20b   : > { %p13_p6 = scmp.ge.s32.totalorder %s16_s19, 6   ;;  %s2378_s13 = smov %s1558_s14 }
 0x20c   : > { %s2379_s14 = smov %s1681_s30  ;;  %s2380_s15 = smov %s1570_s17 }
 0x20d   : > { %s2381_s16 = smov %s1574_s18  ;;  %s2382_s17 = smov %s2385_s22 }
 0x20e   : > { %s2383_s18 = smov %s2389_s23  ;;  %15 = sbr.rel (!%p13_p6) target bundleno = 5 (0x5), region = 67 }
 0x215   :  { %1199 = vsyncpa [#allocation3], 1 }
 0x216   :  { %1201 = vsyncpa [#allocation3 + $0x1], 1 }

</bundles_post_ra>
